<compile_context>
chip_gen: v7x
topology: tpu7x:2x2x1
jax: 0.10.0
libtpu: 0.0.40
codegen_flags: <defaults>
</compile_context>

<pallas_src>
import jax
import jax.numpy as jnp
from jax.experimental import pallas as pl
from jax.experimental.pallas import tpu as pltpu

EPS = 1e-8

_LANE = 128
_MAX_LANES = 4096                      # target 2048-4096 lanes per block
_TILE_VMEM_BUDGET = 8 * 1024 * 1024    # bytes for (2 in + 2 out) pipelined buffers
_VMEM_LIMIT_BYTES = 32 * 1024 * 1024   # scoped-VMEM request (ok on v5e/v6e/v7x)
_MIN_GRID_STEPS = 8                    # keep both v7x TensorCores busy
_MAX_BATCH_BLOCK = 8                   # cap on rows per grid step (unroll bound)


def _round_up(x, m):
    return (x + m - 1) // m * m


def _cln_kernel(y_ref, gamma_ref, beta_ref, out_ref):
    """One (Mb, N, Kt) block: normalize over the channel (sublane) axis.

    y_ref     : (Mb, N, Kt)  input block
    gamma_ref : (N, 1)       per-channel scale
    beta_ref  : (N, 1)       per-channel shift
    out_ref   : (Mb, N, Kt)  normalized output block
    """
    gamma = gamma_ref[...].astype(jnp.float32)          # [N, 1]
    beta = beta_ref[...].astype(jnp.float32)            # [N, 1]
    inv_n = 1.0 / y_ref.shape[1]                        # compile-time constant

    # Small static unroll over the batch rows in this block; each row is an
    # independent [N, Kt] tile (channels on sublanes, positions on lanes).
    for i in range(y_ref.shape[0]):
        y = y_ref[i].astype(jnp.float32)                          # [N, Kt]
        mean = jnp.sum(y, axis=0, keepdims=True) * inv_n          # [1, Kt]
        d = y - mean
        var = jnp.sum(d * d, axis=0, keepdims=True) * inv_n       # [1, Kt] (biased)
        inv_std = jax.lax.rsqrt(var + EPS)                        # EUP slot
        # Recompute (y - mean) instead of reusing `d` so the [N, Kt] f32
        # temporary need not stay live across the variance reduction
        # (one VPU sub is cheaper than a VMEM spill round-trip).
        out_ref[i] = (gamma * ((y - mean) * inv_std) + beta).astype(out_ref.dtype)


def _choose_tiles(M, N, K, itemsize):
    """Pick (Mb, Kt) by VMEM budget rather than exact divisibility."""
    # Largest lane-aligned Kt that covers K (rounded up), capped at _MAX_LANES
    # and at what the (2 in + 2 out) double-buffered blocks allow in VMEM.
    kt_budget = (_TILE_VMEM_BUDGET // max(1, 4 * N * itemsize)) // _LANE * _LANE
    kt = min(_round_up(K, _LANE), _MAX_LANES)
    if kt_budget >= _LANE:
        kt = min(kt, kt_budget)
    kt = max(kt, _LANE)

    # Megacore / pipelining: if the grid would have very few steps, shrink Kt
    # (never below 512 lanes) so both TensorCores get work.
    while M * pl.cdiv(K, kt) < 4 and kt >= 2 * 512:
        kt = _round_up(kt // 2, _LANE)
    nk = pl.cdiv(K, kt)

    # Batch blocking: when one row's block is small, move several rows per
    # step so each DMA is ~1 MiB (amortizes the ~600-cycle step overhead),
    # without busting the budget or starving the grid.
    mb = 1
    blk = lambda mb_: mb_ * N * kt * itemsize
    while (2 * mb <= min(M, _MAX_BATCH_BLOCK)
           and blk(mb) < (1 << 20)
           and 4 * blk(2 * mb) <= _TILE_VMEM_BUDGET
           and pl.cdiv(M, 2 * mb) * nk >= _MIN_GRID_STEPS):
        mb *= 2
    return mb, kt


def channelwise_layer_norm(y, gamma, beta):
    """Pallas cLN forward.

    y     : [M, N, K]   (any float dtype; bf16 recommended if the model is bf16)
    gamma : [1, N, 1]   (PyTorch parameter layout)
    beta  : [1, N, 1]
    returns [M, N, K], same dtype as y.
    """
    M, N, K = y.shape
    g = gamma.reshape(N, 1)
    b = beta.reshape(N, 1)

    mb, kt = _choose_tiles(M, N, K, jnp.dtype(y.dtype).itemsize)
    grid = (pl.cdiv(M, mb), pl.cdiv(K, kt))

    # Deeper input buffering only when the VMEM budget forces genuinely small
    # tiles; at >=256-lane tiles default double-buffering already hides DMA.
    y_in_kwargs = {}
    if kt <= _LANE and grid[1] > 2:
        y_in_kwargs["pipeline_mode"] = pl.Buffered(3)

    return pl.pallas_call(
        _cln_kernel,
        out_shape=jax.ShapeDtypeStruct((M, N, K), y.dtype),
        grid_spec=pltpu.PrefetchScalarGridSpec(
            num_scalar_prefetch=0,
            grid=grid,
            in_specs=[
                pl.BlockSpec((mb, N, kt), lambda m, k: (m, 0, k), **y_in_kwargs),
                pl.BlockSpec((N, 1), lambda m, k: (0, 0)),
                pl.BlockSpec((N, 1), lambda m, k: (0, 0)),
            ],
            out_specs=pl.BlockSpec((mb, N, kt), lambda m, k: (m, 0, k)),
        ),
        compiler_params=pltpu.CompilerParams(
            dimension_semantics=("parallel", "parallel"),
            vmem_limit_bytes=_VMEM_LIMIT_BYTES),
    )(y, g, b)


def _reference_cln(y, gamma, beta):
    """Plain-JAX reference mirroring the PyTorch module (computed in f32)."""
    y = y.astype(jnp.float32)
    gamma = gamma.astype(jnp.float32)
    beta = beta.astype(jnp.float32)
    mean = jnp.mean(y, axis=1, keepdims=True)
    var = jnp.mean((y - mean) ** 2, axis=1, keepdims=True)  # unbiased=False
    return gamma * (y - mean) / jnp.sqrt(var + EPS) + beta


if __name__ == "__main__":
    key = jax.random.PRNGKey(0)

    def _run_case(M, N, K, dtype, atol):
        sub = jax.random.fold_in(key, M * 100000 + N * 1000 + K)
        k1, k2, k3 = jax.random.split(sub, 3)
        y = jax.random.normal(k1, (M, N, K), dtype=jnp.float32).astype(dtype)
        gamma = (1.0 + 0.1 * jax.random.normal(k2, (1, N, 1), jnp.float32)).astype(dtype)
        beta = (0.1 * jax.random.normal(k3, (1, N, 1), jnp.float32)).astype(dtype)

        out = channelwise_layer_norm(y, gamma, beta)
        jax.block_until_ready(out)
        assert out.shape == (M, N, K), out.shape
        assert out.dtype == dtype, out.dtype

        ref = _reference_cln(y, gamma, beta)
        err = float(jnp.max(jnp.abs(out.astype(jnp.float32) - ref)))
        assert err <= atol, (M, N, K, str(dtype), err)

    # Primary small case (f32), matches the module's [batch, channels, length].
    _run_case(2, 32, 256, jnp.float32, 1e-5)
    # Odd K (exercises the cdiv/padded last K tile) with bf16 I/O.
    _run_case(3, 16, 200, jnp.bfloat16, 5e-2)
    # Larger batch, small channel count -> exercises Mb>1 batch blocking.
    _run_case(16, 8, 256, jnp.float32, 1e-5)

    print("KERNEL_OK")
</pallas_src>

<mosaic_0001>
module attributes {stable_mosaic.version = 11 : i64} {
  func.func @_cln_kernel(%arg0: i32, %arg1: i32, %arg2: memref<1x32x256xf32, #tpu.memory_space<vmem>>, %arg3: memref<32x1xf32, #tpu.memory_space<vmem>>, %arg4: memref<32x1xf32, #tpu.memory_space<vmem>>, %arg5: memref<1x32x256xf32, #tpu.memory_space<vmem>>) attributes {dimension_semantics = [#tpu.dimension_semantics<parallel>, #tpu.dimension_semantics<parallel>], iteration_bounds = array<i64: 2, 1>, scalar_prefetch = 0 : i64, scratch_operands = 0 : i64, tpu.core_type = #tpu.core_type<tc>, window_params = [{transform_indices = @transform_0, window_bounds = array<i64: 1, 32, 256>}, {pipeline_mode = #tpu.pipeline_mode<synchronous>, transform_indices = @transform_1, window_bounds = array<i64: 32, 1>}, {pipeline_mode = #tpu.pipeline_mode<synchronous>, transform_indices = @transform_2, window_bounds = array<i64: 32, 1>}, {transform_indices = @transform_3, window_bounds = array<i64: 1, 32, 256>}]} {
    %c0 = arith.constant 0 : index
    %c0_0 = arith.constant 0 : index
    %0 = vector.load %arg3[%c0, %c0_0] : memref<32x1xf32, #tpu.memory_space<vmem>>, vector<32x1xf32>
    %c0_1 = arith.constant 0 : index
    %c0_2 = arith.constant 0 : index
    %1 = vector.load %arg4[%c0_1, %c0_2] : memref<32x1xf32, #tpu.memory_space<vmem>>, vector<32x1xf32>
    %c0_3 = arith.constant 0 : index
    %c0_4 = arith.constant 0 : index
    %c0_5 = arith.constant 0 : index
    %2 = vector.load %arg2[%c0_3, %c0_4, %c0_5] : memref<1x32x256xf32, #tpu.memory_space<vmem>>, vector<1x32x256xf32>
    %3 = vector.shape_cast %2 : vector<1x32x256xf32> to vector<32x256xf32>
    %cst = arith.constant dense<0.000000e+00> : vector<256xf32>
    %4 = vector.multi_reduction <add>, %3, %cst [0] : vector<32x256xf32> to vector<256xf32>
    %5 = vector.shape_cast %4 : vector<256xf32> to vector<1x256xf32>
    %cst_6 = arith.constant 3.125000e-02 : f32
    %6 = vector.broadcast %cst_6 : f32 to vector<1x256xf32>
    %7 = arith.mulf %5, %6 : vector<1x256xf32>
    %8 = vector.broadcast %7 : vector<1x256xf32> to vector<32x256xf32>
    %9 = arith.subf %3, %8 : vector<32x256xf32>
    %10 = arith.mulf %9, %9 : vector<32x256xf32>
    %cst_7 = arith.constant dense<0.000000e+00> : vector<256xf32>
    %11 = vector.multi_reduction <add>, %10, %cst_7 [0] : vector<32x256xf32> to vector<256xf32>
    %12 = vector.shape_cast %11 : vector<256xf32> to vector<1x256xf32>
    %cst_8 = arith.constant 3.125000e-02 : f32
    %13 = vector.broadcast %cst_8 : f32 to vector<1x256xf32>
    %14 = arith.mulf %12, %13 : vector<1x256xf32>
    %cst_9 = arith.constant 9.99999993E-9 : f32
    %15 = vector.broadcast %cst_9 : f32 to vector<1x256xf32>
    %16 = arith.addf %14, %15 : vector<1x256xf32>
    %17 = math.rsqrt %16 : vector<1x256xf32>
    %18 = vector.broadcast %7 : vector<1x256xf32> to vector<32x256xf32>
    %19 = arith.subf %3, %18 : vector<32x256xf32>
    %20 = vector.broadcast %17 : vector<1x256xf32> to vector<32x256xf32>
    %21 = arith.mulf %19, %20 : vector<32x256xf32>
    %22 = vector.broadcast %0 : vector<32x1xf32> to vector<32x256xf32>
    %23 = arith.mulf %22, %21 : vector<32x256xf32>
    %24 = vector.broadcast %1 : vector<32x1xf32> to vector<32x256xf32>
    %25 = arith.addf %23, %24 : vector<32x256xf32>
    %c0_10 = arith.constant 0 : index
    %c0_11 = arith.constant 0 : index
    %c0_12 = arith.constant 0 : index
    %26 = vector.load %arg5[%c0_10, %c0_11, %c0_12] : memref<1x32x256xf32, #tpu.memory_space<vmem>>, vector<1x32x256xf32>
    %27 = vector.shape_cast %26 : vector<1x32x256xf32> to vector<32x256xf32>
    %28 = vector.shape_cast %25 : vector<32x256xf32> to vector<1x32x256xf32>
    tpu.vector_store %arg5[%c0_10, %c0_11, %c0_12], %28 {strides = array<i32>} : memref<1x32x256xf32, #tpu.memory_space<vmem>>, vector<1x32x256xf32>,
    return
  }
  func.func @transform_0(%arg0: i32, %arg1: i32) -> (i32, i32, i32) {
    %c0_i32 = arith.constant 0 : i32
    %c0_i32_0 = arith.constant 0 : i32
    return %arg0, %c0_i32, %arg1 : i32, i32, i32
  }
  func.func @transform_1(%arg0: i32, %arg1: i32) -> (i32, i32) {
    %c0_i32 = arith.constant 0 : i32
    %c0_i32_0 = arith.constant 0 : i32
    %c0_i32_1 = arith.constant 0 : i32
    return %c0_i32, %c0_i32_0 : i32, i32
  }
  func.func @transform_2(%arg0: i32, %arg1: i32) -> (i32, i32) {
    %c0_i32 = arith.constant 0 : i32
    %c0_i32_0 = arith.constant 0 : i32
    %c0_i32_1 = arith.constant 0 : i32
    return %c0_i32, %c0_i32_0 : i32, i32
  }
  func.func @transform_3(%arg0: i32, %arg1: i32) -> (i32, i32, i32) {
    %c0_i32 = arith.constant 0 : i32
    %c0_i32_0 = arith.constant 0 : i32
    return %arg0, %c0_i32, %arg1 : i32, i32, i32
  }
}

</mosaic_0001>

<bundles_post_ra>
// kernel: tpu_custom_call.1
= control target key start
LH: loop header
LB: loop body
LE: loop exit
PB: predicated region body
PF: predicated region fallthrough
CT: control target
= control target key end

     0   :  { %8 = vsyncpa [#allocation3], 0  ;;  %s904_s0 = inlined_call_operand.hbm [shape: f32[2,32,256], index: 0, kind: input, shape index: {}]   ;;  %s905_s1 = inlined_call_operand.vmem [shape: f32[32,1], index: 1, kind: input, shape index: {}]   ;;  %s906_s2 = inlined_call_operand.vmem [shape: f32[32,1], index: 2, kind: input, shape index: {}]   ;;  %s907_s3 = inlined_call_operand.hbm [shape: f32[2,32,256], index: 3, kind: output, shape index: {}]  }
   0x1   :  { %10 = vsyncpa [#allocation3 + $0x1], 0 }
   0x2   :  { %11 = vsyncpa [#allocation4], 0 }
   0x3   :  { %13 = vsyncpa [#allocation4 + $0x1], 0  ;;  %s691_s12 = smov 0   ;;  %s693_s13 = smov 0  }
   0x4   :  { %s695_s14 = smov 0   ;;  %s697_s15 = smov 0  }
   0x5   :  { %s699_s16 = smov 0   ;;  %s701_s17 = smov 0  }
   0x6 LB: > { %s460_s18 = sadd.s32 4294967295, %s662_s17   ;;  %s461_s19 = sadd.s32 4294967294, %s662_s17   ;;  %s662_s17 = sphi %s701_s17, %s19_s17   ;;  %s658_s16 = sphi %s699_s16, %s922_s16   ;;  %s654_s15 = sphi %s697_s15, %s921_s15   ;;  %s650_s14 = sphi %s695_s14, %s920_s14   ;;  %s646_s13 = sphi %s693_s13, %s919_s13   ;;  %s642_s12 = sphi %s691_s12, %s918_s12  }
   0x7   : > { %s31_s20 = sadd.s32 1, %s658_s16  ;;  %s40_s21 = sadd.s32 1, %s650_s14 }
   0x8   : > { %p33_p0 = scmp.ge.s32.totalorder %s31_s20, 2  ;;  %p47_p1 = scmp.ne.s32.totalorder %s650_s14, %s646_s13 }
   0x9   : > { %p48_p2 = scmp.eq.s32.totalorder %s662_s17, 0  ;;  %p53_p3 = scmp.ne.s32.totalorder %s646_s13, %s642_s12 }
   0xa   : > { %s924_s20 = smov (%p33_p0, %s31_s20), 0  ;;  %p54_p5 = scmp.eq.s32.totalorder %s460_s18, 0 }
   0xb   : > { %p732_p4 = por %p48_p2, %p47_p1  ;;  %s35_s23 = ssub.s32 %s658_s16, %s924_s20 }
   0xc   : > { %p121_p6 = scmp.eq.s32.totalorder %s460_s18, 1  ;;  %p38_p7 = scmp.eq.s32.totalorder %s35_s23, 0 }
   0xd   : > { %p738_p8 = por %p54_p5, %p53_p3  ;;  %p127_p10 = scmp.eq.s32.totalorder %s461_s19, 1 }
   0xe   : > { %p742_p9 = por %p121_p6, %p47_p1  ;;  %p489_p13 = scmp.lt.s32.totalorder %s662_s17, 2 }
   0xf   : > { %s747_s26 = scalar_select %p38_p7, %s650_s14, %s40_s21  }
  0x10   : > { %s911_s25 = scalar_select %p742_p9, 1, 0 }
  0x11   : > { %p749_p11 = por %p127_p10, %p53_p3  ;;  %s153_s28 = sand.u32 1, %s650_s14  }
  0x12   : > { %s464_s29 = sshll.u32 %s153_s28, 6  ;;  %s475_s30 = sshll.u32 %s658_s16, 10 }
  0x13   : > { %s912_s27 = scalar_select %p749_p11, 1, 0 }
  0x14   : > { %s760_s6 = scalar_lea.hbm %s904_s0, %s475_s30  ;;  %s157_s7 = scalar_lea.vmem [#allocation2], %s464_s29 }
  0x15   : > { %s166_s8 = sshll.u32 %s157_s7, 4  ;;  %p766_p0 = pnand %p489_p13, %p732_p4  ;;  %s762_s8 = int_to_ptr.vmem [resolvable:$true] %s166_s8 }
  0x16   : > { %s771_s10 = scalar_lea.sflag [#allocation3], %s153_s28  ;;  %s550_s11 = scalar_lea.hbm %s760_s6, 1024 }
  0x17   : > { %p551_p2 = scmp.ne.s32.totalorder %s760_s6, %s550_s11  ;;  %p552_p3 = pneg %p766_p0 }
  0x18   : > { %s555_s21 = scalar_lea.hbm %s904_s0, 2048  ;;  %p556_p4 = scmp.lt.u32.totalorder %s760_s6, %s904_s0 }
  0x19   : > { %p553_p5 = pnand %p552_p3, %p551_p2  ;;  %p557_p7 = scmp.lt.u32.totalorder %s555_s21, %s550_s11 }
  0x1a   : > { %p559_p13 = scmp.lt.u32.totalorder %s550_s11, %s760_s6 }
  0x1b   : > { %p554_p6 = pneg %p553_p5  ;;  %p558_p10 = por %p557_p7, %p556_p4 }
  0x1d   : > { %p560_p12 = por %p559_p13, %p558_p10 }
  0x1f   : > { %p561_p1 = pnand %p560_p12, %p554_p6 }
  0x21   : > { %564 = shalt.err (!%p561_p1)
}
  0x22   : > { %s565_s28 = scalar_lea.vmem %s762_s8, 1024  ;;  %s664_s29 = smov [#allocation2]  }
  0x23   : > { %p566_p2 = scmp.ne.s32.totalorder %s762_s8, %s565_s28  ;;  %s570_s30 = sshll.u32 %s664_s29, 4  ;;  %s571_s30 = int_to_ptr.vmem [resolvable:$false] %s570_s30 }
  0x24   : > { %s572_s4 = scalar_lea.vmem %s571_s30, 2048  ;;  %p573_p9 = scmp.lt.s32.totalorder %s762_s8, %s571_s30 }
  0x25   : > { %p568_p5 = pnand %p566_p2, %p552_p3  ;;  %p574_p4 = scmp.lt.s32.totalorder %s572_s4, %s565_s28 }
  0x27   : > { %p569_p11 = pneg %p568_p5  ;;  %p575_p7 = por %p574_p4, %p573_p9 }
  0x29   : > { %p576_p10 = pnand %p575_p7, %p569_p11 }
  0x2b   : > { %579 = shalt.err (!%p576_p10)
}
  0x2c   : > { %s665_s5 = smov 256   ;;  %s666_s7 = smov 16  }
  0x2d   : > { %484 = dma.hbm_to_vmem [thread:$0]  (!%p766_p0), %s760_s6, 1024, %s762_s8, %s771_s10, %s665_s5, %s665_s5, %s666_s7  }
  0x2e   : > { %p174_p12 = scmp.lt.s32.totalorder %s662_s17, 3  ;;  %p914_p1 = scmp.ge.s32.totalorder %s662_s17, 1 }
  0x30   : > { %p175_p3 = pnand %p914_p1, %p174_p12 }
  0x31   : > { %s803_s11 = sand.u32 (!%p175_p3), 1, %s646_s13  }
  0x32   : > { %178 = sbr.rel (%p175_p3) target bundleno = 218 (0xda), region = 32  ;;  %s468_s18 = sshll.u32 (!%p175_p3), %s803_s11, 6 }
  0x33   : > { %s181_s19 = scalar_lea.sflag (!%p175_p3), [#allocation3], %s803_s11  ;;  %s809_s21 = scalar_lea.vmem (!%p175_p3), [#allocation2], %s468_s18 }
  0x39   : > { %633 = dma.done.wait (%p738_p8), %s181_s19, 1024  }
  0x3a   : > { %635 = vsyncadd (%p738_p8), %s181_s19, 4294966272  ;;  %v667_v0 = vmov 0   ;;  %v211_v1 = vld [vmem:[%s905_s1 + $0x10] sm:$0xff]  ;;  %v209_v2 = vld [vmem:[%s905_s1] sm:$0xff]  ;;  %s476_s10 = sshll.u32 %s654_s15, 10  ;;  %s358_s23 = scalar_lea.sflag [#allocation4], %s803_s11 }
  0x3b   : > { %545 = vset.pattern.permute.xlu1 %v667_v0  ;;  %544 = vset.pattern.permute.xlu0 %v667_v0  ;;  %v212_v3 = vld [vmem:[%s905_s1 + $0x18] sm:$0xff]  ;;  %v210_v4 = vld [vmem:[%s905_s1 + $0x8] sm:$0xff]  ;;  %v213_v6 = vld [vmem:[%s906_s2] sm:$0xff]  ;;  %s855_s15 = scalar_lea.hbm %s907_s3, %s476_s10  ;;  %p915_p9 = scmp.ne.s32.totalorder %s911_s25, 0 }
  0x3c   : > { %305 = vperm.xlu1 %545, %v211_v1   ;;  %295 = vperm.xlu0 %544, %v209_v2   ;;  %v214_v5 = vld [vmem:[%s906_s2 + $0x8] sm:$0xff]  ;;  %v216_v7 = vld [vmem:[%s906_s2 + $0x18] sm:$0xff]  ;;  %v215_v8 = vld [vmem:[%s906_s2 + $0x10] sm:$0xff]  ;;  %s668_s28 = smov [#allocation5]  }
  0x3d   : > { %v217_v9 = vld [vmem:[%s809_s21] sm:$0xff]  ;;  %v219_v10 = vld [vmem:[%s809_s21 + $0x10] sm:$0xff]  ;;  %v218_v11 = vld [vmem:[%s809_s21 + $0x8] sm:$0xff]  ;;  %s584_s29 = sshll.u32 %s668_s28, 4  ;;  %s585_s29 = int_to_ptr.vmem [resolvable:$false] %s584_s29 }
  0x3e   : > { %v220_v12 = vld [vmem:[%s809_s21 + $0x18] sm:$0xff]  ;;  %v225_v13 = vadd.f32 %v219_v10, %v217_v9  ;;  %v221_v14 = vld [vmem:[%s809_s21 + $0x20] sm:$0xff]  ;;  %v222_v16 = vld [vmem:[%s809_s21 + $0x28] sm:$0xff]  ;;  %s586_s30 = scalar_lea.vmem %s585_s29, 2048 }
  0x3f   : > { %v234_v15 = vadd.f32 %v220_v12, %v218_v11  ;;  %v223_v18 = vld [vmem:[%s809_s21 + $0x30] sm:$0xff]  ;;  %v224_v20 = vld [vmem:[%s809_s21 + $0x38] sm:$0xff]  ;;  %s206_s21 = scalar_lea.vmem [#allocation5], %s468_s18 }
  0x40   : > { %310 = vperm.xlu1 %545, %v212_v3   ;;  %300 = vperm.xlu0 %544, %v210_v4   ;;  %v226_v17 = vadd.f32 %v225_v13, %v221_v14  ;;  %s373_s9 = sshll.u32 %s206_s21, 4  ;;  %s850_s9 = int_to_ptr.vmem [resolvable:$true] %s373_s9 }
  0x41   : > { %v235_v19 = vadd.f32 %v234_v15, %v222_v16  ;;  %s580_s24 = scalar_lea.vmem %s850_s9, 1024  ;;  %p587_p6 = scmp.lt.s32.totalorder %s850_s9, %s585_s29 }
  0x42   : > { %v227_v21 = vadd.f32 %v226_v17, %v223_v18  ;;  %p581_p8 = scmp.ne.s32.totalorder %s850_s9, %s580_s24  ;;  %p588_p13 = scmp.lt.s32.totalorder %s586_s30, %s580_s24 }
  0x43   : > { %v236_v22 = vadd.f32 %v235_v19, %v224_v20 }
  0x44   : > { %328 = vperm.xlu1 %545, %v214_v5   ;;  %323 = vperm.xlu0 %544, %v213_v6   ;;  %v228_v23 = vrot.slane %v227_v21, 4  ;;  %p582_p11 = pnand %p581_p8, %p915_p9  ;;  %p589_p2 = por %p588_p13, %p587_p6 }
  0x45   : > { %v237_v24 = vrot.slane %v236_v22, 4 }
  0x46   : > { %v229_v25 = vadd.f32 %v228_v23, %v227_v21  ;;  %p583_p0 = pneg %p582_p11 }
  0x47   : > { %v238_v26 = vadd.f32 %v237_v24, %v236_v22 }
  0x48   : > { %338 = vperm.xlu1 %545, %v216_v7   ;;  %333 = vperm.xlu0 %544, %v215_v8   ;;  %v230_v27 = vrot.slane %v229_v25, 2  ;;  %p590_p5 = pnand %p589_p2, %p583_p0 }
  0x49   : > { %v239_v28 = vrot.slane %v238_v26, 2 }
  0x4a   : > { %v231_v29 = vadd.f32 %v230_v27, %v229_v25 }
  0x4b   : > { %v240_v30 = vadd.f32 %v239_v28, %v238_v26 }
  0x4c   : > { %v232_v31 = vrot.slane %v231_v29, 1 }
  0x4d   : > { %v241_v32 = vrot.slane %v240_v30, 1 }
  0x4e   : > { %v233_v33 = vadd.f32 %v232_v31, %v231_v29 }
  0x4f   : > { %v242_v34 = vadd.f32 %v241_v32, %v240_v30 }
  0x50   : > { %v243_v35 = vmul.f32 0.03125, %v233_v33 }
  0x51   : > { %v244_v36 = vmul.f32 0.03125, %v242_v34 }
  0x52   : > { %v245_v37 = vsub.f32 %v217_v9, %v243_v35  ;;  %v247_v38 = vsub.f32 %v219_v10, %v243_v35  ;;  %v249_v41 = vsub.f32 %v221_v14, %v243_v35  ;;  %v251_v47 = vsub.f32 %v223_v18, %v243_v35 }
  0x53   : > { %v246_v39 = vsub.f32 %v218_v11, %v244_v36  ;;  %v248_v40 = vsub.f32 %v220_v12, %v244_v36  ;;  %v250_v44 = vsub.f32 %v222_v16, %v244_v36  ;;  %v252_v50 = vsub.f32 %v224_v20, %v244_v36 }
  0x54   : > { %v253_v42 = vmul.f32 %v245_v37, %v245_v37  ;;  %v255_v43 = vmul.f32 %v247_v38, %v247_v38  ;;  %v257_v48 = vmul.f32 %v249_v41, %v249_v41  ;;  %v259_v53 = vmul.f32 %v251_v47, %v251_v47 }
  0x55   : > { %v254_v45 = vmul.f32 %v246_v39, %v246_v39  ;;  %v256_v46 = vmul.f32 %v248_v40, %v248_v40  ;;  %v258_v51 = vmul.f32 %v250_v44, %v250_v44  ;;  %v260_v55 = vmul.f32 %v252_v50, %v252_v50 }
  0x56   : > { %v261_v49 = vadd.f32 %v255_v43, %v253_v42 }
  0x57   : > { %v270_v52 = vadd.f32 %v256_v46, %v254_v45 }
  0x58   : > { %v262_v54 = vadd.f32 %v261_v49, %v257_v48 }
  0x59   : > { %v271_v56 = vadd.f32 %v270_v52, %v258_v51 }
  0x5a   : > { %v263_v57 = vadd.f32 %v262_v54, %v259_v53 }
  0x5b   : > { %v272_v58 = vadd.f32 %v271_v56, %v260_v55 }
  0x5c   : > { %v264_v59 = vrot.slane %v263_v57, 4 }
  0x5d   : > { %v273_v60 = vrot.slane %v272_v58, 4 }
  0x5e   : > { %v265_v61 = vadd.f32 %v264_v59, %v263_v57 }
  0x5f   : > { %v274_v62 = vadd.f32 %v273_v60, %v272_v58 }
  0x60   : > { %v266_v63 = vrot.slane %v265_v61, 2 }
  0x61   : > { %v275_v0 = vrot.slane %v274_v62, 2 }
  0x62   : > { %v267_v1 = vadd.f32 %v266_v63, %v265_v61 }
  0x63   : > { %v276_v2 = vadd.f32 %v275_v0, %v274_v62 }
  0x64   : > { %v268_v3 = vrot.slane %v267_v1, 1 }
  0x65   : > { %v277_v4 = vrot.slane %v276_v2, 1 }
  0x66   : > { %v269_v5 = vadd.f32 %v268_v3, %v267_v1 }
  0x67   : > { %v278_v6 = vadd.f32 %v277_v4, %v276_v2 }
  0x68   : > { %v279_v7 = vmul.f32 0.03125, %v269_v5 }
  0x69   : > { %v280_v8 = vmul.f32 0.03125, %v278_v6 }
  0x6a   : > { %v281_v9 = vadd.f32 1e-08, %v279_v7 }
  0x6b   : > { %v282_v10 = vadd.f32 1e-08, %v280_v8 }
  0x6c   : > { %546 = vrsqrt.f32 %v281_v9 }
  0x6d   : > { %548 = vrsqrt.f32 %v282_v10 }
  0x76   : > { %v547_v11 = vpop.eup %546 }
  0x77   : > { %v549_v12 = vpop.eup %548  ;;  %v285_v15 = vmul.f32 %v547_v11, %v245_v37  ;;  %v287_v17 = vmul.f32 %v547_v11, %v247_v38  ;;  %v289_v21 = vmul.f32 %v547_v11, %v249_v41  ;;  %v291_v23 = vmul.f32 %v547_v11, %v251_v47 }
  0x78   : > { %v286_v16 = vmul.f32 %v549_v12, %v246_v39  ;;  %v288_v18 = vmul.f32 %v549_v12, %v248_v40  ;;  %v290_v22 = vmul.f32 %v549_v12, %v250_v44  ;;  %v292_v24 = vmul.f32 %v549_v12, %v252_v50 }
  0xbb   : > { %v306_v13 = vpop.permute.xlu1 %305  ;;  %v296_v14 = vpop.permute.xlu0 %295 }
  0xbc   : > { %v313_v25 = vmul.f32 %v296_v14, %v285_v15  ;;  %v314_v26 = vmul.f32 %v296_v14, %v286_v16  ;;  %v317_v35 = vmul.f32 %v306_v13, %v289_v21  ;;  %v318_v36 = vmul.f32 %v306_v13, %v290_v22 }
  0xbf   : > { %v311_v19 = vpop.permute.xlu1 %310  ;;  %v301_v20 = vpop.permute.xlu0 %300 }
  0xc0   : > { %v315_v27 = vmul.f32 %v301_v20, %v287_v17  ;;  %v316_v28 = vmul.f32 %v301_v20, %v288_v18  ;;  %v319_v37 = vmul.f32 %v311_v19, %v291_v23  ;;  %v320_v38 = vmul.f32 %v311_v19, %v292_v24 }
  0xc3   : > { %v329_v29 = vpop.permute.xlu1 %328  ;;  %v324_v30 = vpop.permute.xlu0 %323 }
  0xc4   : > { %v343_v31 = vadd.f32 %v329_v29, %v315_v27  ;;  %v344_v32 = vadd.f32 %v329_v29, %v316_v28  ;;  %v341_v33 = vadd.f32 %v324_v30, %v313_v25  ;;  %v342_v34 = vadd.f32 %v324_v30, %v314_v26 }
  0xc6   : > { %351 = vst [vmem:[%s206_s21 + $0x10] sm:$0xff] %v343_v31  ;;  %352 = vst [vmem:[%s206_s21 + $0x18] sm:$0xff] %v344_v32 }
  0xc7   : > { %349 = vst [vmem:[%s206_s21] sm:$0xff] %v341_v33  ;;  %350 = vst [vmem:[%s206_s21 + $0x8] sm:$0xff] %v342_v34  ;;  %v339_v39 = vpop.permute.xlu1 %338  ;;  %v334_v40 = vpop.permute.xlu0 %333 }
  0xc8   : > { %v347_v41 = vadd.f32 %v339_v39, %v319_v37  ;;  %v348_v42 = vadd.f32 %v339_v39, %v320_v38  ;;  %v345_v43 = vadd.f32 %v334_v40, %v317_v35  ;;  %v346_v44 = vadd.f32 %v334_v40, %v318_v36 }
  0xca   : > { %355 = vst [vmem:[%s206_s21 + $0x30] sm:$0xff] %v347_v41  ;;  %356 = vst [vmem:[%s206_s21 + $0x38] sm:$0xff] %v348_v42 }
  0xcb   : > { %353 = vst [vmem:[%s206_s21 + $0x20] sm:$0xff] %v345_v43  ;;  %354 = vst [vmem:[%s206_s21 + $0x28] sm:$0xff] %v346_v44 }
  0xcc   : > { %593 = shalt.err (!%p590_p5)
}
  0xcd   : > { %s594_s4 = scalar_lea.hbm %s855_s15, 1024  ;;  %s598_s19 = scalar_lea.hbm %s907_s3, 2048 }
  0xce   : > { %p595_p4 = scmp.ne.s32.totalorder %s855_s15, %s594_s4  ;;  %p599_p12 = scmp.lt.u32.totalorder %s855_s15, %s907_s3 }
  0xcf   : > { %p600_p1 = scmp.lt.u32.totalorder %s598_s19, %s594_s4  ;;  %p602_p8 = scmp.lt.u32.totalorder %s594_s4, %s855_s15 }
  0xd0   : > { %p596_p7 = pnand %p595_p4, %p915_p9 }
  0xd1   : > { %p601_p3 = por %p600_p1, %p599_p12 }
  0xd2   : > { %p597_p10 = pneg %p596_p7 }
  0xd3   : > { %p603_p11 = por %p602_p8, %p601_p3 }
  0xd5   : > { %p604_p0 = pnand %p603_p11, %p597_p10 }
  0xd7   : > { %607 = shalt.err (!%p604_p0)
}
  0xd8   : > { %s669_s21 = smov 256   ;;  %s670_s10 = smov 16  }
  0xd9   : > { %479 = dma.vmem_to_hbm [thread:$0]  (%p915_p9), %s850_s9, 1024, %s855_s15, %s358_s23, %s669_s21, %s669_s21, %s670_s10  }
  0xda PF: > { %s388_s18 = sand.u32 1, %s642_s12   ;;  %p916_p6 = scmp.ne.s32.totalorder %s912_s27, 0 }
  0xdb   : > { %p917_p13 = scmp.ge.s32.totalorder %s662_s17, 2  ;;  %s389_s22 = scalar_lea.sflag [#allocation4], %s388_s18 }
  0xdd   : > { %p486_p2 = pnand %p917_p13, %p916_p6 }
  0xdf   : > { %637 = dma.done.wait (!%p486_p2), %s389_s22, 1024  }
  0xe0   : > { %639 = vsyncadd (!%p486_p2), %s389_s22, 4294966272  ;;  %s19_s17 = sadd.s32 1, %s662_s17   ;;  %s918_s12 = smov %s646_s13 }
  0xe1   : > { %p16_p5 = scmp.ge.s32.totalorder %s19_s17, 4   ;;  %s919_s13 = smov %s650_s14 }
  0xe2   : > { %s920_s14 = smov %s747_s26  ;;  %s921_s15 = smov %s658_s16 }
  0xe3   : > { %s922_s16 = smov %s924_s20  ;;  %18 = sbr.rel (!%p16_p5) target bundleno = 6 (0x6), region = 77 }
  0xea   :  { %394 = vsyncpa [#allocation3], 1 }
  0xeb   :  { %396 = vsyncpa [#allocation3 + $0x1], 1 }
  0xec   :  { %397 = vsyncpa [#allocation4], 1 }
  0xed   :  { %399 = vsyncpa [#allocation4 + $0x1], 1 }

</bundles_post_ra>
